<compile_context>
chip_gen: v6e
topology: v6e:2x2x1
jax: 0.10.0
libtpu: 0.0.40
codegen_flags: <defaults>
</compile_context>

<pallas_src>
from math import comb as math_comb

import jax
import jax.numpy as jnp
from jax import lax
from jax.experimental import pallas as pl
from jax.experimental.pallas import tpu as pltpu


def _exp_bernstein_kernel(K, approx_recip):
    comb_k = [float(math_comb(K - 1, k)) for k in range(K)]

    def kernel(gamma_ref, cutoff_ref, d_ref, o_ref):
        d = d_ref[...]                       # (tile_r, C) float32, lane-dense
        gamma = gamma_ref[0]                 # SMEM scalars
        cutoff = cutoff_ref[0]

        d2 = d * d
        c2 = cutoff * cutoff
        mask = d < cutoff
        # Guard the denominator so d >= cutoff never produces inf/NaN before
        # the select (forward values identical to torch.where semantics).
        denom = jnp.where(mask, c2 - d2, jnp.ones_like(d))
        env = jnp.exp(-d2 * pl.reciprocal(denom, approx=approx_recip))  # EUP
        f_cut = jnp.where(mask, env, jnp.zeros_like(d))                 # (tile_r, C)

        x = jnp.exp(-gamma * d)              # (tile_r, C)
        omx = 1.0 - x

        # Pass 1 (descending k): o[k] = f_cut * (1-x)^(K-1-k).
        # Single running product; only ~3 full-tile temporaries stay live.
        p = f_cut
        for k in range(K - 1, -1, -1):
            o_ref[k] = p.astype(o_ref.dtype)             # full-width store
            if k > 0:
                p = p * omx

        # Pass 2 (ascending k): o[k] *= comb(K-1,k) * x^k.
        # k == 0 is a no-op (comb = 1, x^0 = 1).
        if K > 1:
            xk = x
            for k in range(1, K):
                c = comb_k[k]
                scale = xk if c == 1.0 else xk * c
                o_ref[k] = (o_ref[k] * scale).astype(o_ref.dtype)
                if k + 1 < K:
                    xk = xk * x

    return kernel


def _choose_layout(N, K, out_itemsize, budget_bytes,
                   max_lane_width=512, max_tile_rows=1024):
    """Pick (lane_width C, tile_r, grid_n, padded rows R) for this N / K / dtype."""
    # Lane width: largest of {128, 256, 512} that still gives >= one full
    # 8-row tile of real data (keeps padded-element waste low for small N).
    C = 128
    for cand in (256, 512):
        if cand <= max_lane_width and N >= 8 * cand:
            C = cand

    rows = pl.cdiv(N, C)
    rows8 = max(8, ((rows + 7) // 8) * 8)

    # Per-grid-step VMEM: double-buffered input + output blocks plus ~4 live
    # f32 temporaries in the two-pass elementwise body.
    def step_bytes(tr):
        in_b = tr * C * 4
        out_b = K * tr * C * out_itemsize
        tmp_b = 4 * tr * C * 4
        return 2 * (in_b + out_b) + tmp_b

    tile_max = min(max_tile_rows, rows8)
    tile_max -= tile_max % 8
    tile_max = max(tile_max, 8)
    while tile_max > 8 and step_bytes(tile_max) > budget_bytes:
        tile_max -= 8

    grid_n = pl.cdiv(rows8, tile_max)
    # Keep both v7x TensorCores busy ("parallel" grid axis) when there is
    # enough work for two steps; harmless on v5e/v6e.
    if grid_n == 1 and rows8 >= 16:
        grid_n = 2

    # tile_r ~ ceil(rows8 / grid_n) rounded to 8: padding is at most a few
    # rows instead of up to a full tile of wasted writeback.
    tile_r = ((pl.cdiv(rows8, grid_n) + 7) // 8) * 8
    R = grid_n * tile_r
    return C, tile_r, grid_n, R, step_bytes(tile_r)


def exp_bernstein_basis_kmajor(distances, gamma, cutoff, K, *,
                               out_dtype=jnp.float32,
                               approx_recip=False,
                               vmem_budget_bytes=16 * 1024 * 1024):
    """distances: (N,) -> K-major (K, N) basis (no transpose, reshape+slice only)."""
    distances = jnp.asarray(distances)
    N = distances.shape[0]
    out_itemsize = jnp.dtype(out_dtype).itemsize

    C, tile_r, grid_n, R, need_bytes = _choose_layout(
        N, K, out_itemsize, vmem_budget_bytes)
    n_pad = R * C

    d_flat = distances.astype(jnp.float32)
    if n_pad != N:
        d_flat = jnp.pad(d_flat, (0, n_pad - N))
    d2d = d_flat.reshape(R, C)

    gamma_arr = jnp.asarray(gamma, dtype=jnp.float32).reshape((1,))
    cutoff_arr = jnp.asarray(cutoff, dtype=jnp.float32).reshape((1,))

    cost = pl.CostEstimate(
        flops=(3 * K + 6) * n_pad,
        transcendentals=2 * n_pad,
        bytes_accessed=(4 + K * out_itemsize) * n_pad,
    )

    vmem_limit = int(min(max(2 * need_bytes + (2 << 20), 8 << 20), 56 << 20))

    out_kc = pl.pallas_call(
        _exp_bernstein_kernel(K, approx_recip),
        out_shape=jax.ShapeDtypeStruct((K, R, C), out_dtype),
        grid_spec=pltpu.PrefetchScalarGridSpec(
            num_scalar_prefetch=0,
            grid=(grid_n,),
            in_specs=[
                pl.BlockSpec(memory_space=pltpu.MemorySpace.SMEM),  # gamma
                pl.BlockSpec(memory_space=pltpu.MemorySpace.SMEM),  # cutoff
                pl.BlockSpec((tile_r, C), lambda i: (i, 0)),        # distances
            ],
            out_specs=pl.BlockSpec((K, tile_r, C), lambda i: (0, i, 0)),
        ),
        compiler_params=pltpu.CompilerParams(
            dimension_semantics=("parallel",),
            vmem_limit_bytes=vmem_limit),
        cost_estimate=cost,
    )(gamma_arr, cutoff_arr, d2d)

    # (K, R, C) -> (K, N): pure reshape + slice — no transpose, no extra pass.
    return out_kc.reshape(K, R * C)[:, :N]


def project_from_kmajor(basis_kn, weight_kf, *, precision=None):
    """Contract the K axis of the K-major basis with a (K, F) weight.

    Equivalent to (basis.T @ weight) but never materializes the (N, K) tensor;
    this is how a downstream linear layer should consume the kernel output.
    """
    return lax.dot_general(basis_kn, weight_kf,
                           (((0,), (0,)), ((), ())),
                           precision=precision)


def exp_bernstein_basis(distances, gamma, cutoff, K, **kwargs):
    """Module-compatible (N, K) output.

    NOTE: the kernel is writeback-bound, so this explicit transpose roughly
    doubles HBM traffic; prefer exp_bernstein_basis_kmajor + project_from_kmajor
    when the basis feeds a linear layer.
    """
    out_kn = exp_bernstein_basis_kmajor(distances, gamma, cutoff, K, **kwargs)
    return jnp.transpose(out_kn, (1, 0))


def _reference(distances, gamma, cutoff, K):
    d = distances.astype(jnp.float32)
    f_cut = jnp.where(d < cutoff,
                      jnp.exp(-d ** 2 / (cutoff ** 2 - d ** 2)),
                      jnp.zeros_like(d))
    x = jnp.exp(-gamma * d)
    comb_k = jnp.asarray([math_comb(K - 1, k) for k in range(K)],
                         dtype=jnp.float32)
    out = jnp.stack([x ** k * (1 - x) ** (K - 1 - k) for k in range(K)],
                    axis=-1)
    return out * comb_k[None, :] * f_cut[:, None]


if __name__ == "__main__":
    K = 8
    gamma = 0.5
    cutoff = 5.0
    N = 256

    key = jax.random.PRNGKey(0)
    # distances in [0, 6]: some exceed the cutoff so the f_cut mask is exercised
    distances = jax.random.uniform(key, (N,), dtype=jnp.float32,
                                   minval=0.0, maxval=6.0)

    ref = _reference(distances, gamma, cutoff, K)

    # K-major path (preferred, no transpose).
    out_kn = exp_bernstein_basis_kmajor(distances, gamma, cutoff, K)
    out_kn = jax.block_until_ready(out_kn)
    assert out_kn.shape == (K, N)
    assert jnp.allclose(out_kn, ref.T, atol=1e-5, rtol=1e-5), "K-major mismatch"

    # Module-compatible (N, K) path.
    out_nk = exp_bernstein_basis(distances, gamma, cutoff, K)
    out_nk = jax.block_until_ready(out_nk)
    assert out_nk.shape == (N, K)
    assert jnp.allclose(out_nk, ref, atol=1e-5, rtol=1e-5), "(N,K) mismatch"

    # Consumer-style contraction straight off the K-major output.
    F = 32
    w = jax.random.normal(jax.random.PRNGKey(1), (K, F), dtype=jnp.float32)
    proj = project_from_kmajor(out_kn, w, precision=lax.Precision.HIGHEST)
    proj = jax.block_until_ready(proj)
    ref_proj = ref @ w
    assert proj.shape == (N, F)
    assert jnp.allclose(proj, ref_proj, atol=1e-4, rtol=1e-4), "projection mismatch"

    print("KERNEL_OK")
</pallas_src>

<mosaic_0001>
module attributes {stable_mosaic.version = 11 : i64} {
  func.func @kernel(%arg0: i32, %arg1: memref<1xf32, #tpu.memory_space<smem>>, %arg2: memref<1xf32, #tpu.memory_space<smem>>, %arg3: memref<8x128xf32, #tpu.memory_space<vmem>>, %arg4: memref<8x8x128xf32, #tpu.memory_space<vmem>>) attributes {dimension_semantics = [#tpu.dimension_semantics<parallel>], iteration_bounds = array<i64: 1>, scalar_prefetch = 0 : i64, scratch_operands = 0 : i64, tpu.core_type = #tpu.core_type<tc>, window_params = [{transform_indices = @transform_0, window_bounds = array<i64: 1>}, {transform_indices = @transform_1, window_bounds = array<i64: 1>}, {transform_indices = @transform_2, window_bounds = array<i64: 8, 128>}, {transform_indices = @transform_3, window_bounds = array<i64: 8, 8, 128>}]} {
    %c0 = arith.constant 0 : index
    %c0_0 = arith.constant 0 : index
    %0 = vector.load %arg3[%c0, %c0_0] : memref<8x128xf32, #tpu.memory_space<vmem>>, vector<8x128xf32>
    %c0_1 = arith.constant 0 : index
    %1 = memref.load %arg1[%c0_1] : memref<1xf32, #tpu.memory_space<smem>>
    %c0_2 = arith.constant 0 : index
    %2 = memref.load %arg2[%c0_2] : memref<1xf32, #tpu.memory_space<smem>>
    %3 = arith.mulf %0, %0 : vector<8x128xf32>
    %4 = arith.mulf %2, %2 : f32
    %5 = vector.broadcast %2 : f32 to vector<8x128xf32>
    %6 = arith.cmpf olt, %0, %5 : vector<8x128xf32>
    %7 = vector.broadcast %4 : f32 to vector<8x128xf32>
    %8 = arith.subf %7, %3 : vector<8x128xf32>
    %cst = arith.constant 1.000000e+00 : f32
    %9 = vector.broadcast %cst : f32 to vector<8x128xf32>
    %10 = arith.select %6, %8, %9 : vector<8x128xi1>, vector<8x128xf32>
    %cst_3 = arith.constant 0.000000e+00 : f32
    %11 = vector.broadcast %cst_3 : f32 to vector<8x128xf32>
    %12 = arith.subf %11, %3 : vector<8x128xf32>
    %13 = tpu.reciprocal %10 : vector<8x128xf32> -> vector<8x128xf32>
    %14 = arith.mulf %12, %13 : vector<8x128xf32>
    %15 = math.exp %14 : vector<8x128xf32>
    %cst_4 = arith.constant 0.000000e+00 : f32
    %16 = vector.broadcast %cst_4 : f32 to vector<8x128xf32>
    %17 = arith.select %6, %15, %16 : vector<8x128xi1>, vector<8x128xf32>
    %cst_5 = arith.constant 0.000000e+00 : f32
    %18 = arith.subf %cst_5, %1 : f32
    %19 = vector.broadcast %18 : f32 to vector<8x128xf32>
    %20 = arith.mulf %19, %0 : vector<8x128xf32>
    %21 = math.exp %20 : vector<8x128xf32>
    %cst_6 = arith.constant 1.000000e+00 : f32
    %22 = vector.broadcast %cst_6 : f32 to vector<8x128xf32>
    %23 = arith.subf %22, %21 : vector<8x128xf32>
    %c7 = arith.constant 7 : index
    %c0_7 = arith.constant 0 : index
    %c0_8 = arith.constant 0 : index
    %24 = vector.load %arg4[%c7, %c0_7, %c0_8] : memref<8x8x128xf32, #tpu.memory_space<vmem>>, vector<1x8x128xf32>
    %25 = vector.shape_cast %24 : vector<1x8x128xf32> to vector<8x128xf32>
    %26 = vector.shape_cast %17 : vector<8x128xf32> to vector<1x8x128xf32>
    tpu.vector_store %arg4[%c7, %c0_7, %c0_8], %26 {strides = array<i32>} : memref<8x8x128xf32, #tpu.memory_space<vmem>>, vector<1x8x128xf32>,
    %27 = arith.mulf %17, %23 : vector<8x128xf32>
    %c6 = arith.constant 6 : index
    %c0_9 = arith.constant 0 : index
    %c0_10 = arith.constant 0 : index
    %28 = vector.load %arg4[%c6, %c0_9, %c0_10] : memref<8x8x128xf32, #tpu.memory_space<vmem>>, vector<1x8x128xf32>
    %29 = vector.shape_cast %28 : vector<1x8x128xf32> to vector<8x128xf32>
    %30 = vector.shape_cast %27 : vector<8x128xf32> to vector<1x8x128xf32>
    tpu.vector_store %arg4[%c6, %c0_9, %c0_10], %30 {strides = array<i32>} : memref<8x8x128xf32, #tpu.memory_space<vmem>>, vector<1x8x128xf32>,
    %31 = arith.mulf %27, %23 : vector<8x128xf32>
    %c5 = arith.constant 5 : index
    %c0_11 = arith.constant 0 : index
    %c0_12 = arith.constant 0 : index
    %32 = vector.load %arg4[%c5, %c0_11, %c0_12] : memref<8x8x128xf32, #tpu.memory_space<vmem>>, vector<1x8x128xf32>
    %33 = vector.shape_cast %32 : vector<1x8x128xf32> to vector<8x128xf32>
    %34 = vector.shape_cast %31 : vector<8x128xf32> to vector<1x8x128xf32>
    tpu.vector_store %arg4[%c5, %c0_11, %c0_12], %34 {strides = array<i32>} : memref<8x8x128xf32, #tpu.memory_space<vmem>>, vector<1x8x128xf32>,
    %35 = arith.mulf %31, %23 : vector<8x128xf32>
    %c4 = arith.constant 4 : index
    %c0_13 = arith.constant 0 : index
    %c0_14 = arith.constant 0 : index
    %36 = vector.load %arg4[%c4, %c0_13, %c0_14] : memref<8x8x128xf32, #tpu.memory_space<vmem>>, vector<1x8x128xf32>
    %37 = vector.shape_cast %36 : vector<1x8x128xf32> to vector<8x128xf32>
    %38 = vector.shape_cast %35 : vector<8x128xf32> to vector<1x8x128xf32>
    tpu.vector_store %arg4[%c4, %c0_13, %c0_14], %38 {strides = array<i32>} : memref<8x8x128xf32, #tpu.memory_space<vmem>>, vector<1x8x128xf32>,
    %39 = arith.mulf %35, %23 : vector<8x128xf32>
    %c3 = arith.constant 3 : index
    %c0_15 = arith.constant 0 : index
    %c0_16 = arith.constant 0 : index
    %40 = vector.load %arg4[%c3, %c0_15, %c0_16] : memref<8x8x128xf32, #tpu.memory_space<vmem>>, vector<1x8x128xf32>
    %41 = vector.shape_cast %40 : vector<1x8x128xf32> to vector<8x128xf32>
    %42 = vector.shape_cast %39 : vector<8x128xf32> to vector<1x8x128xf32>
    tpu.vector_store %arg4[%c3, %c0_15, %c0_16], %42 {strides = array<i32>} : memref<8x8x128xf32, #tpu.memory_space<vmem>>, vector<1x8x128xf32>,
    %43 = arith.mulf %39, %23 : vector<8x128xf32>
    %c2 = arith.constant 2 : index
    %c0_17 = arith.constant 0 : index
    %c0_18 = arith.constant 0 : index
    %44 = vector.load %arg4[%c2, %c0_17, %c0_18] : memref<8x8x128xf32, #tpu.memory_space<vmem>>, vector<1x8x128xf32>
    %45 = vector.shape_cast %44 : vector<1x8x128xf32> to vector<8x128xf32>
    %46 = vector.shape_cast %43 : vector<8x128xf32> to vector<1x8x128xf32>
    tpu.vector_store %arg4[%c2, %c0_17, %c0_18], %46 {strides = array<i32>} : memref<8x8x128xf32, #tpu.memory_space<vmem>>, vector<1x8x128xf32>,
    %47 = arith.mulf %43, %23 : vector<8x128xf32>
    %c1 = arith.constant 1 : index
    %c0_19 = arith.constant 0 : index
    %c0_20 = arith.constant 0 : index
    %48 = vector.load %arg4[%c1, %c0_19, %c0_20] : memref<8x8x128xf32, #tpu.memory_space<vmem>>, vector<1x8x128xf32>
    %49 = vector.shape_cast %48 : vector<1x8x128xf32> to vector<8x128xf32>
    %50 = vector.shape_cast %47 : vector<8x128xf32> to vector<1x8x128xf32>
    tpu.vector_store %arg4[%c1, %c0_19, %c0_20], %50 {strides = array<i32>} : memref<8x8x128xf32, #tpu.memory_space<vmem>>, vector<1x8x128xf32>,
    %51 = arith.mulf %47, %23 : vector<8x128xf32>
    %c0_21 = arith.constant 0 : index
    %c0_22 = arith.constant 0 : index
    %c0_23 = arith.constant 0 : index
    %52 = vector.load %arg4[%c0_21, %c0_22, %c0_23] : memref<8x8x128xf32, #tpu.memory_space<vmem>>, vector<1x8x128xf32>
    %53 = vector.shape_cast %52 : vector<1x8x128xf32> to vector<8x128xf32>
    %54 = vector.shape_cast %51 : vector<8x128xf32> to vector<1x8x128xf32>
    tpu.vector_store %arg4[%c0_21, %c0_22, %c0_23], %54 {strides = array<i32>} : memref<8x8x128xf32, #tpu.memory_space<vmem>>, vector<1x8x128xf32>,
    %cst_24 = arith.constant 7.000000e+00 : f32
    %55 = vector.broadcast %cst_24 : f32 to vector<8x128xf32>
    %56 = arith.mulf %21, %55 : vector<8x128xf32>
    %c1_25 = arith.constant 1 : index
    %c0_26 = arith.constant 0 : index
    %c0_27 = arith.constant 0 : index
    %57 = vector.load %arg4[%c1_25, %c0_26, %c0_27] : memref<8x8x128xf32, #tpu.memory_space<vmem>>, vector<1x8x128xf32>
    %58 = vector.shape_cast %57 : vector<1x8x128xf32> to vector<8x128xf32>
    %59 = arith.mulf %58, %56 : vector<8x128xf32>
    %c1_28 = arith.constant 1 : index
    %c0_29 = arith.constant 0 : index
    %c0_30 = arith.constant 0 : index
    %60 = vector.load %arg4[%c1_28, %c0_29, %c0_30] : memref<8x8x128xf32, #tpu.memory_space<vmem>>, vector<1x8x128xf32>
    %61 = vector.shape_cast %60 : vector<1x8x128xf32> to vector<8x128xf32>
    %62 = vector.shape_cast %59 : vector<8x128xf32> to vector<1x8x128xf32>
    tpu.vector_store %arg4[%c1_28, %c0_29, %c0_30], %62 {strides = array<i32>} : memref<8x8x128xf32, #tpu.memory_space<vmem>>, vector<1x8x128xf32>,
    %63 = arith.mulf %21, %21 : vector<8x128xf32>
    %cst_31 = arith.constant 2.100000e+01 : f32
    %64 = vector.broadcast %cst_31 : f32 to vector<8x128xf32>
    %65 = arith.mulf %63, %64 : vector<8x128xf32>
    %c2_32 = arith.constant 2 : index
    %c0_33 = arith.constant 0 : index
    %c0_34 = arith.constant 0 : index
    %66 = vector.load %arg4[%c2_32, %c0_33, %c0_34] : memref<8x8x128xf32, #tpu.memory_space<vmem>>, vector<1x8x128xf32>
    %67 = vector.shape_cast %66 : vector<1x8x128xf32> to vector<8x128xf32>
    %68 = arith.mulf %67, %65 : vector<8x128xf32>
    %c2_35 = arith.constant 2 : index
    %c0_36 = arith.constant 0 : index
    %c0_37 = arith.constant 0 : index
    %69 = vector.load %arg4[%c2_35, %c0_36, %c0_37] : memref<8x8x128xf32, #tpu.memory_space<vmem>>, vector<1x8x128xf32>
    %70 = vector.shape_cast %69 : vector<1x8x128xf32> to vector<8x128xf32>
    %71 = vector.shape_cast %68 : vector<8x128xf32> to vector<1x8x128xf32>
    tpu.vector_store %arg4[%c2_35, %c0_36, %c0_37], %71 {strides = array<i32>} : memref<8x8x128xf32, #tpu.memory_space<vmem>>, vector<1x8x128xf32>,
    %72 = arith.mulf %63, %21 : vector<8x128xf32>
    %cst_38 = arith.constant 3.500000e+01 : f32
    %73 = vector.broadcast %cst_38 : f32 to vector<8x128xf32>
    %74 = arith.mulf %72, %73 : vector<8x128xf32>
    %c3_39 = arith.constant 3 : index
    %c0_40 = arith.constant 0 : index
    %c0_41 = arith.constant 0 : index
    %75 = vector.load %arg4[%c3_39, %c0_40, %c0_41] : memref<8x8x128xf32, #tpu.memory_space<vmem>>, vector<1x8x128xf32>
    %76 = vector.shape_cast %75 : vector<1x8x128xf32> to vector<8x128xf32>
    %77 = arith.mulf %76, %74 : vector<8x128xf32>
    %c3_42 = arith.constant 3 : index
    %c0_43 = arith.constant 0 : index
    %c0_44 = arith.constant 0 : index
    %78 = vector.load %arg4[%c3_42, %c0_43, %c0_44] : memref<8x8x128xf32, #tpu.memory_space<vmem>>, vector<1x8x128xf32>
    %79 = vector.shape_cast %78 : vector<1x8x128xf32> to vector<8x128xf32>
    %80 = vector.shape_cast %77 : vector<8x128xf32> to vector<1x8x128xf32>
    tpu.vector_store %arg4[%c3_42, %c0_43, %c0_44], %80 {strides = array<i32>} : memref<8x8x128xf32, #tpu.memory_space<vmem>>, vector<1x8x128xf32>,
    %81 = arith.mulf %72, %21 : vector<8x128xf32>
    %cst_45 = arith.constant 3.500000e+01 : f32
    %82 = vector.broadcast %cst_45 : f32 to vector<8x128xf32>
    %83 = arith.mulf %81, %82 : vector<8x128xf32>
    %c4_46 = arith.constant 4 : index
    %c0_47 = arith.constant 0 : index
    %c0_48 = arith.constant 0 : index
    %84 = vector.load %arg4[%c4_46, %c0_47, %c0_48] : memref<8x8x128xf32, #tpu.memory_space<vmem>>, vector<1x8x128xf32>
    %85 = vector.shape_cast %84 : vector<1x8x128xf32> to vector<8x128xf32>
    %86 = arith.mulf %85, %83 : vector<8x128xf32>
    %c4_49 = arith.constant 4 : index
    %c0_50 = arith.constant 0 : index
    %c0_51 = arith.constant 0 : index
    %87 = vector.load %arg4[%c4_49, %c0_50, %c0_51] : memref<8x8x128xf32, #tpu.memory_space<vmem>>, vector<1x8x128xf32>
    %88 = vector.shape_cast %87 : vector<1x8x128xf32> to vector<8x128xf32>
    %89 = vector.shape_cast %86 : vector<8x128xf32> to vector<1x8x128xf32>
    tpu.vector_store %arg4[%c4_49, %c0_50, %c0_51], %89 {strides = array<i32>} : memref<8x8x128xf32, #tpu.memory_space<vmem>>, vector<1x8x128xf32>,
    %90 = arith.mulf %81, %21 : vector<8x128xf32>
    %cst_52 = arith.constant 2.100000e+01 : f32
    %91 = vector.broadcast %cst_52 : f32 to vector<8x128xf32>
    %92 = arith.mulf %90, %91 : vector<8x128xf32>
    %c5_53 = arith.constant 5 : index
    %c0_54 = arith.constant 0 : index
    %c0_55 = arith.constant 0 : index
    %93 = vector.load %arg4[%c5_53, %c0_54, %c0_55] : memref<8x8x128xf32, #tpu.memory_space<vmem>>, vector<1x8x128xf32>
    %94 = vector.shape_cast %93 : vector<1x8x128xf32> to vector<8x128xf32>
    %95 = arith.mulf %94, %92 : vector<8x128xf32>
    %c5_56 = arith.constant 5 : index
    %c0_57 = arith.constant 0 : index
    %c0_58 = arith.constant 0 : index
    %96 = vector.load %arg4[%c5_56, %c0_57, %c0_58] : memref<8x8x128xf32, #tpu.memory_space<vmem>>, vector<1x8x128xf32>
    %97 = vector.shape_cast %96 : vector<1x8x128xf32> to vector<8x128xf32>
    %98 = vector.shape_cast %95 : vector<8x128xf32> to vector<1x8x128xf32>
    tpu.vector_store %arg4[%c5_56, %c0_57, %c0_58], %98 {strides = array<i32>} : memref<8x8x128xf32, #tpu.memory_space<vmem>>, vector<1x8x128xf32>,
    %99 = arith.mulf %90, %21 : vector<8x128xf32>
    %cst_59 = arith.constant 7.000000e+00 : f32
    %100 = vector.broadcast %cst_59 : f32 to vector<8x128xf32>
    %101 = arith.mulf %99, %100 : vector<8x128xf32>
    %c6_60 = arith.constant 6 : index
    %c0_61 = arith.constant 0 : index
    %c0_62 = arith.constant 0 : index
    %102 = vector.load %arg4[%c6_60, %c0_61, %c0_62] : memref<8x8x128xf32, #tpu.memory_space<vmem>>, vector<1x8x128xf32>
    %103 = vector.shape_cast %102 : vector<1x8x128xf32> to vector<8x128xf32>
    %104 = arith.mulf %103, %101 : vector<8x128xf32>
    %c6_63 = arith.constant 6 : index
    %c0_64 = arith.constant 0 : index
    %c0_65 = arith.constant 0 : index
    %105 = vector.load %arg4[%c6_63, %c0_64, %c0_65] : memref<8x8x128xf32, #tpu.memory_space<vmem>>, vector<1x8x128xf32>
    %106 = vector.shape_cast %105 : vector<1x8x128xf32> to vector<8x128xf32>
    %107 = vector.shape_cast %104 : vector<8x128xf32> to vector<1x8x128xf32>
    tpu.vector_store %arg4[%c6_63, %c0_64, %c0_65], %107 {strides = array<i32>} : memref<8x8x128xf32, #tpu.memory_space<vmem>>, vector<1x8x128xf32>,
    %108 = arith.mulf %99, %21 : vector<8x128xf32>
    %c7_66 = arith.constant 7 : index
    %c0_67 = arith.constant 0 : index
    %c0_68 = arith.constant 0 : index
    %109 = vector.load %arg4[%c7_66, %c0_67, %c0_68] : memref<8x8x128xf32, #tpu.memory_space<vmem>>, vector<1x8x128xf32>
    %110 = vector.shape_cast %109 : vector<1x8x128xf32> to vector<8x128xf32>
    %111 = arith.mulf %110, %108 : vector<8x128xf32>
    %c7_69 = arith.constant 7 : index
    %c0_70 = arith.constant 0 : index
    %c0_71 = arith.constant 0 : index
    %112 = vector.load %arg4[%c7_69, %c0_70, %c0_71] : memref<8x8x128xf32, #tpu.memory_space<vmem>>, vector<1x8x128xf32>
    %113 = vector.shape_cast %112 : vector<1x8x128xf32> to vector<8x128xf32>
    %114 = vector.shape_cast %111 : vector<8x128xf32> to vector<1x8x128xf32>
    tpu.vector_store %arg4[%c7_69, %c0_70, %c0_71], %114 {strides = array<i32>} : memref<8x8x128xf32, #tpu.memory_space<vmem>>, vector<1x8x128xf32>,
    return
  }
  func.func @transform_0(%arg0: i32) -> i32 {
    %c0_i32 = arith.constant 0 : i32
    %c0_i32_0 = arith.constant 0 : i32
    return %c0_i32 : i32
  }
  func.func @transform_1(%arg0: i32) -> i32 {
    %c0_i32 = arith.constant 0 : i32
    %c0_i32_0 = arith.constant 0 : i32
    return %c0_i32 : i32
  }
  func.func @transform_2(%arg0: i32) -> (i32, i32) {
    %c0_i32 = arith.constant 0 : i32
    %c0_i32_0 = arith.constant 0 : i32
    return %arg0, %c0_i32 : i32, i32
  }
  func.func @transform_3(%arg0: i32) -> (i32, i32, i32) {
    %c0_i32 = arith.constant 0 : i32
    %c0_i32_0 = arith.constant 0 : i32
    %c0_i32_1 = arith.constant 0 : i32
    return %c0_i32, %arg0, %c0_i32_0 : i32, i32, i32
  }
}

</mosaic_0001>

<bundles_post_ra>
// kernel: tpu_custom_call.1
= control target key start
LH: loop header
LB: loop body
LE: loop exit
PB: predicated region body
PF: predicated region fallthrough
CT: control target
= control target key end

     0   :  { %10 = vsyncpa [#allocation5], 0  ;;  %s225_s0 = inlined_call_operand.<no memory space> [shape: f32[1], index: 0, kind: input, shape index: {}]   ;;  %s226_s1 = inlined_call_operand.<no memory space> [shape: f32[1], index: 1, kind: input, shape index: {}]   ;;  %s227_s2 = inlined_call_operand.hbm [shape: f32[8,128], index: 2, kind: input, shape index: {}]   ;;  %s228_s3 = inlined_call_operand.hbm [shape: f32[8,8,128], index: 3, kind: output, shape index: {}]  }
   0x1   :  { %11 = vsyncpa [#allocation6], 0  ;;  %s177_s12 = smov [#allocation4]  }
   0x2   :  { %s22_s13 = sshll.u32 %s177_s12, 4  ;;  %s23_s13 = int_to_ptr.vmem [resolvable:$true] %s22_s13 }
   0x3   :  { %s141_s14 = scalar_lea.vmem %s23_s13, 128  ;;  %p146_p1 = scmp.lt.s32.totalorder %s23_s13, %s23_s13 }
   0x4   :  { %p142_p0 = scmp.ne.s32.totalorder %s23_s13, %s141_s14  ;;  %p147_p2 = scmp.lt.s32.totalorder %s141_s14, %s141_s14 }
   0x6   :  { %p148_p3 = por %p147_p2, %p146_p1 }
   0x8   :  { %p149_p4 = pnand %p148_p3, %p142_p0 }
   0xa   :  { %152 = shalt.err (!%p149_p4)
}
   0xb   :  { %25 = dma.hbm_to_vmem [thread:$0]  %s227_s2, 128, %s23_s13, [#allocation5]  }
   0xc   :  { %173 = dma.done.wait [#allocation5], 128  }
   0xd   :  { %174 = vsyncadd [#allocation5], 4294967168  ;;  %s45_s19 = ssub.f32 0.0, %s225_s0  ;;  %s33_s22 = smul.f32 %s226_s1, %s226_s1  ;;  %v34_v1 = vstv %s226_s1  ;;  %v29_v2 = vld [vmem:[#allocation4] sm:$0xff] }
   0xe   :  { %v32_v4 = vmul.f32 %v29_v2, %v29_v2  ;;  %vm214_vm0 = vcmp.lt.f32.partialorder %v29_v2, %v34_v1  ;;  %s178_s0 = smov [#allocation7]  }
   0xf   :  { %v46_v0 = vstv %s45_s19  ;;  %v36_v3 = vstv %s33_s22  ;;  %s111_s1 = sshll.u32 %s178_s0, 4  ;;  %s112_s1 = int_to_ptr.vmem [resolvable:$true] %s111_s1 }
  0x10   :  { %v47_v5 = vmul.f32 %v46_v0, %v29_v2  ;;  %v37_v7 = vsub.f32 %v36_v3, %v32_v4  ;;  %v39_v10 = vsub.f32 0.0, %v32_v4  ;;  %s153_s2 = scalar_lea.vmem %s112_s1, 1024  ;;  %p158_p6 = scmp.lt.s32.totalorder %s112_s1, %s112_s1 }
  0x11   :  { %p154_p5 = scmp.ne.s32.totalorder %s112_s1, %s153_s2  ;;  %p159_p7 = scmp.lt.s32.totalorder %s153_s2, %s153_s2 }
  0x12   :  { %v48_v8 = vmul.f32 1.442695, %v47_v5  ;;  %v38_v9 = vsel %vm214_vm0, %v37_v7, 1.0 }
  0x13   :  { %p160_p8 = por %p159_p7, %p158_p6 }
  0x14   :  { %127 = vpow2.f32 %v48_v8 }
  0x15   :  { %129 = vrcp.f32 %v38_v9  ;;  %p161_p9 = pnand %p160_p8, %p154_p5 }
  0x21   :  { %v128_v11 = vpop.eup %127 }
  0x22   :  { %v130_v12 = vpop.eup %129  ;;  %v77_v13 = vmul.f32 %v128_v11, %v128_v11  ;;  %v50_v20 = vsub.f32 1.0, %v128_v11  ;;  %v73_v38 = vmul.f32 7.0, %v128_v11 }
  0x23   :  { %v41_v14 = vmul.f32 %v130_v12, %v39_v10 }
  0x24   :  { %v82_v15 = vmul.f32 %v128_v11, %v77_v13  ;;  %v78_v35 = vmul.f32 21.0, %v77_v13 }
  0x25   :  { %v42_v16 = vmul.f32 1.442695, %v41_v14 }
  0x26   :  { %v87_v17 = vmul.f32 %v128_v11, %v82_v15  ;;  %v83_v32 = vmul.f32 35.0, %v82_v15 }
  0x27   :  { %131 = vpow2.f32 %v42_v16 }
  0x28   :  { %v92_v18 = vmul.f32 %v128_v11, %v87_v17  ;;  %v88_v29 = vmul.f32 35.0, %v87_v17 }
  0x2a   :  { %v97_v19 = vmul.f32 %v128_v11, %v92_v18  ;;  %v93_v26 = vmul.f32 21.0, %v92_v18 }
  0x2c   :  { %v102_v21 = vmul.f32 %v128_v11, %v97_v19  ;;  %v98_v23 = vmul.f32 7.0, %v97_v19 }
  0x34   :  { %v132_v22 = vpop.eup %131 }
  0x35   :  { %v44_v24 = vsel %vm214_vm0, %v132_v22, 0.0 }
  0x36   :  { %v53_v25 = vmul.f32 %v50_v20, %v44_v24  ;;  %v104_v27 = vmul.f32 %v102_v21, %v44_v24 }
  0x38   :  { %v56_v28 = vmul.f32 %v53_v25, %v50_v20  ;;  %v100_v30 = vmul.f32 %v98_v23, %v53_v25  ;;  %105 = vst [vmem:[#allocation7 + $0x38] sm:$0xff] %v104_v27 }
  0x3a   :  { %v59_v31 = vmul.f32 %v56_v28, %v50_v20  ;;  %v95_v33 = vmul.f32 %v93_v26, %v56_v28  ;;  %101 = vst [vmem:[#allocation7 + $0x30] sm:$0xff] %v100_v30 }
  0x3c   :  { %v62_v34 = vmul.f32 %v59_v31, %v50_v20  ;;  %v90_v36 = vmul.f32 %v88_v29, %v59_v31  ;;  %96 = vst [vmem:[#allocation7 + $0x28] sm:$0xff] %v95_v33 }
  0x3e   :  { %v65_v37 = vmul.f32 %v62_v34, %v50_v20  ;;  %v85_v39 = vmul.f32 %v83_v32, %v62_v34  ;;  %91 = vst [vmem:[#allocation7 + $0x20] sm:$0xff] %v90_v36 }
  0x40   :  { %v68_v40 = vmul.f32 %v65_v37, %v50_v20  ;;  %v80_v41 = vmul.f32 %v78_v35, %v65_v37  ;;  %86 = vst [vmem:[#allocation7 + $0x18] sm:$0xff] %v85_v39 }
  0x42   :  { %v71_v42 = vmul.f32 %v68_v40, %v50_v20  ;;  %v75_v43 = vmul.f32 %v73_v38, %v68_v40  ;;  %81 = vst [vmem:[#allocation7 + $0x10] sm:$0xff] %v80_v41 }
  0x44   :  { %72 = vst [vmem:[#allocation7] sm:$0xff] %v71_v42  ;;  %76 = vst [vmem:[#allocation7 + $0x8] sm:$0xff] %v75_v43 }
  0x45   :  { %164 = shalt.err (!%p161_p9)
}
  0x46   :  { %s179_s25 = smov 128   ;;  %s180_s26 = smov 8  }
  0x47   :  { %117 = dma.vmem_to_hbm [thread:$0]  %s112_s1, 1024, %s228_s3, [#allocation6], %s179_s25, %s179_s25, %s180_s26  }
  0x48   :  { %175 = dma.done.wait [#allocation6], 1024  }
  0x49   :  { %176 = vsyncadd [#allocation6], 4294966272 }
  0x4a   :  { %121 = vsyncpa [#allocation5], 1 }
  0x4b   :  { %122 = vsyncpa [#allocation6], 1 }

</bundles_post_ra>
